<compile_context>
chip_gen: v7x
topology: tpu7x:2x2x1
jax: 0.10.0
libtpu: 0.0.40
codegen_flags: <defaults>
</compile_context>

<pallas_src>
import functools

import jax
import jax.numpy as jnp
from jax.experimental import pallas as pl
from jax.experimental.pallas import tpu as pltpu

HIDDEN = 128   # fc1 output width (fixed by the module)
LANE = 128     # TPU lane width
SUBLANE = 8    # f32 sublane width


def _mlp_kernel(x_ref, w1_ref, b1_ref, w2_ref, b2_ref, h_ref, y_ref,
                *, precision):
    # x_ref:  (tile_m, dims_p)   VMEM (streamed per grid step, f32 or bf16)
    # w1_ref: (dims_p, HIDDEN)   VMEM (resident, single-buffered)
    # b1_ref: (1, HIDDEN)        VMEM (f32)
    # w2_ref: (HIDDEN, dims_p)   VMEM (resident, single-buffered)
    # b2_ref: (1, dims_p)        VMEM (f32)
    # h_ref:  (tile_m, HIDDEN)   out 1 = sigmoid(fc1(x))        (f32)
    # y_ref:  (tile_m, dims_p)   out 2 = fc2(sigmoid(fc1(x)))   (f32)
    x = x_ref[...]

    # fc1 (MXU, f32 accumulation) + bias + sigmoid in f32 (sigmoid -> EUP).
    z1 = jnp.dot(x, w1_ref[...],
                 preferred_element_type=jnp.float32, precision=precision)
    h = jax.nn.sigmoid(z1 + b1_ref[...])
    h_ref[...] = h.astype(h_ref.dtype)

    # fc2 (MXU, f32 accumulation); cast h to the weight dtype for the dot.
    z2 = jnp.dot(h.astype(w2_ref.dtype), w2_ref[...],
                 preferred_element_type=jnp.float32, precision=precision)
    y_ref[...] = (z2 + b2_ref[...]).astype(y_ref.dtype)


def _round_up(n, m):
    return ((n + m - 1) // m) * m


def _vmem_capacity_bytes():
    """Physical VMEM per TensorCore for the attached TPU generation."""
    try:
        return int(pltpu.get_tpu_info().vmem_capacity_bytes)
    except Exception:
        return 64 << 20  # conservative fallback (v7x per-TC VMEM)


def _footprints(tile_m, dims_p, op_itemsize, out_itemsize):
    # Resident weights/biases (single-buffered via pl.Buffered(1)); biases f32.
    weight_bytes = op_itemsize * 2 * dims_p * HIDDEN + 4 * (HIDDEN + dims_p)
    # Double-buffered streaming refs per grid step: x (op dtype), y + h (f32).
    stream_bytes = 2 * tile_m * (op_itemsize * dims_p
                                 + out_itemsize * (dims_p + HIDDEN))
    return weight_bytes, stream_bytes


def _choose_tile_m(m_rows, dims_p, op_itemsize, out_itemsize, budget_bytes, sub):
    """Row tile: as close to 512 as VMEM allows, floored at 256, >=2 steps."""
    weight_bytes, _ = _footprints(0, dims_p, op_itemsize, out_itemsize)
    per_row = 2 * (op_itemsize * dims_p + out_itemsize * (dims_p + HIDDEN))
    avail = max(budget_bytes - weight_bytes, 1 << 20)
    tile = min(512, avail // per_row)
    # Floor at 256 rows: small tiles pay per-step overhead / short-DMA cost.
    # (For huge dims a dims-split grid axis is the right fix -- see NOTE.)
    tile = max(tile, 256)
    # Guarantee >=2 grid steps (v7x second TensorCore) while tiles stay >=256.
    half = _round_up(-(-m_rows // 2), sub)
    if half >= 256:
        tile = min(tile, half)
    # Never larger than the (rounded-up) batch.
    tile = min(tile, _round_up(m_rows, sub))
    return max(sub, (tile // sub) * sub)


def _vmem_limit_bytes(tile_m, dims_p, op_itemsize, out_itemsize, cap_bytes):
    weight_bytes, stream_bytes = _footprints(tile_m, dims_p,
                                             op_itemsize, out_itemsize)
    est = weight_bytes + stream_bytes
    # 20% + 2 MiB headroom for compiler-internal scratch; hard cap at ~85% of
    # physical VMEM (~54 MiB on v7x, ~108 MiB on v5e/v6e).
    limit = max(est * 12 // 10 + (2 << 20), 16 << 20)
    return int(min(limit, cap_bytes * 85 // 100))


def two_layer_mlp_forward(x, w1, b1, w2, b2, *, tile_m=None,
                          use_bf16_matmul=False):
    """x: (M, dims). Returns (h, y) matching the PyTorch module's forward."""
    M, dims = x.shape
    assert w1.shape == (dims, HIDDEN) and b1.shape == (HIDDEN,)
    assert w2.shape == (HIDDEN, dims) and b2.shape == (dims,)
    out_dtype = x.dtype

    op_dtype = jnp.bfloat16 if use_bf16_matmul else x.dtype
    op_itemsize = jnp.dtype(op_dtype).itemsize
    out_itemsize = jnp.dtype(out_dtype).itemsize
    sub = 16 if op_itemsize == 2 else SUBLANE

    # Pad the feature axis to a lane multiple only when needed (lane-dense y
    # stores).  No batch padding: the ragged last row tile is masked by Pallas.
    dims_p = _round_up(dims, LANE)
    if dims_p != dims:
        x_in = jnp.pad(x, ((0, 0), (0, dims_p - dims)))
        w1_in = jnp.pad(w1, ((0, dims_p - dims), (0, 0)))
        w2_in = jnp.pad(w2, ((0, 0), (0, dims_p - dims)))
        b2_in = jnp.pad(b2, (0, dims_p - dims))
    else:
        x_in, w1_in, w2_in, b2_in = x, w1, w2, b2

    x_in = x_in.astype(op_dtype)
    w1_in = w1_in.astype(op_dtype)
    w2_in = w2_in.astype(op_dtype)
    b1_2d = b1.reshape(1, HIDDEN).astype(jnp.float32)      # bias math in f32
    b2_2d = b2_in.reshape(1, dims_p).astype(jnp.float32)

    cap = _vmem_capacity_bytes()
    if tile_m is None:
        tile_m = _choose_tile_m(M, dims_p, op_itemsize, out_itemsize,
                                cap * 3 // 4, sub)
    assert tile_m % sub == 0, "tile_m must be a multiple of the sublane pack"

    grid = (pl.cdiv(M, tile_m),)
    precision = (jax.lax.Precision.DEFAULT if use_bf16_matmul
                 else jax.lax.Precision.HIGHEST)  # f32-faithful to PyTorch
    kernel = functools.partial(_mlp_kernel, precision=precision)

    def weight_spec(shape):
        # Block index never changes across grid steps -> fetched once,
        # single-buffered to halve its VMEM residency.
        return pl.BlockSpec(shape, lambda i: (0, 0),
                            pipeline_mode=pl.Buffered(1))

    cost = pl.CostEstimate(
        flops=4 * M * dims_p * HIDDEN,                 # two matmuls
        transcendentals=M * HIDDEN,                    # sigmoid -> exp (EUP)
        bytes_accessed=(op_itemsize * (M * dims_p + 2 * dims_p * HIDDEN)
                        + out_itemsize * M * (dims_p + HIDDEN)
                        + 4 * (HIDDEN + dims_p)),
    )

    h, y = pl.pallas_call(
        kernel,
        grid=grid,
        in_specs=[
            pl.BlockSpec((tile_m, dims_p), lambda i: (i, 0)),  # x (streamed)
            weight_spec((dims_p, HIDDEN)),                     # W1 (resident)
            weight_spec((1, HIDDEN)),                          # b1
            weight_spec((HIDDEN, dims_p)),                     # W2 (resident)
            weight_spec((1, dims_p)),                          # b2
        ],
        out_specs=(
            pl.BlockSpec((tile_m, HIDDEN), lambda i: (i, 0)),  # h
            pl.BlockSpec((tile_m, dims_p), lambda i: (i, 0)),  # y (lane-dense)
        ),
        out_shape=(
            jax.ShapeDtypeStruct((M, HIDDEN), out_dtype),
            jax.ShapeDtypeStruct((M, dims_p), out_dtype),
        ),
        compiler_params=pltpu.CompilerParams(
            dimension_semantics=("parallel",),   # row tiles shard across TCs
            vmem_limit_bytes=_vmem_limit_bytes(tile_m, dims_p, op_itemsize,
                                               out_itemsize, cap),
        ),
        cost_estimate=cost,
    )(x_in, w1_in, b1_2d, w2_in, b2_2d)

    if dims_p != dims:
        y = y[:, :dims]
    return h, y


def init_params(key, dims):
    """Deterministic init mimicking nn.Linear's uniform(-1/sqrt(fan_in), ...)."""
    k1, k2, k3, k4 = jax.random.split(key, 4)
    bound1 = 1.0 / jnp.sqrt(dims)
    bound2 = 1.0 / jnp.sqrt(HIDDEN)
    # Stored as (in, out) = transpose of PyTorch's (out, in) weight.
    w1 = jax.random.uniform(k1, (dims, HIDDEN), jnp.float32, -bound1, bound1)
    b1 = jax.random.uniform(k2, (HIDDEN,), jnp.float32, -bound1, bound1)
    w2 = jax.random.uniform(k3, (HIDDEN, dims), jnp.float32, -bound2, bound2)
    b2 = jax.random.uniform(k4, (dims,), jnp.float32, -bound2, bound2)
    return w1, b1, w2, b2


if __name__ == "__main__":
    key = jax.random.PRNGKey(0)
    k_x, k_p, k_x2, k_p2 = jax.random.split(key, 4)
    hp = jax.lax.Precision.HIGHEST

    # Case 1: small shapes, dims not a lane multiple (feature-pad path).
    batch, dims = 16, 64
    x = jax.random.normal(k_x, (batch, dims), jnp.float32)
    w1, b1, w2, b2 = init_params(k_p, dims)
    h, y = two_layer_mlp_forward(x, w1, b1, w2, b2)
    jax.block_until_ready((h, y))
    h_ref = jax.nn.sigmoid(jnp.dot(x, w1, precision=hp) + b1)
    y_ref = jnp.dot(h_ref, w2, precision=hp) + b2
    assert h.shape == (batch, HIDDEN) and y.shape == (batch, dims)
    assert jnp.allclose(h, h_ref, atol=1e-4, rtol=1e-4), "hidden mismatch"
    assert jnp.allclose(y, y_ref, atol=1e-4, rtol=1e-4), "output mismatch"

    # Case 2: lane-aligned dims, ragged batch (exercises masked last row tile).
    batch2, dims2 = 20, 256
    x2 = jax.random.normal(k_x2, (batch2, dims2), jnp.float32)
    w1b, b1b, w2b, b2b = init_params(k_p2, dims2)
    h2, y2 = two_layer_mlp_forward(x2, w1b, b1b, w2b, b2b)
    jax.block_until_ready((h2, y2))
    h2_ref = jax.nn.sigmoid(jnp.dot(x2, w1b, precision=hp) + b1b)
    y2_ref = jnp.dot(h2_ref, w2b, precision=hp) + b2b
    assert h2.shape == (batch2, HIDDEN) and y2.shape == (batch2, dims2)
    assert jnp.allclose(h2, h2_ref, atol=1e-4, rtol=1e-4), "hidden mismatch (ragged)"
    assert jnp.allclose(y2, y2_ref, atol=1e-4, rtol=1e-4), "output mismatch (ragged)"

    print("KERNEL_OK")
</pallas_src>

<mosaic_0001>
module attributes {stable_mosaic.version = 11 : i64} {
  func.func @_mlp_kernel(%arg0: i32, %arg1: memref<16x128xf32, #tpu.memory_space<vmem>>, %arg2: memref<128x128xf32, #tpu.memory_space<vmem>>, %arg3: memref<1x128xf32, #tpu.memory_space<vmem>>, %arg4: memref<128x128xf32, #tpu.memory_space<vmem>>, %arg5: memref<1x128xf32, #tpu.memory_space<vmem>>, %arg6: memref<16x128xf32, #tpu.memory_space<vmem>>, %arg7: memref<16x128xf32, #tpu.memory_space<vmem>>) attributes {dimension_semantics = [#tpu.dimension_semantics<parallel>], iteration_bounds = array<i64: 1>, scalar_prefetch = 0 : i64, scratch_operands = 0 : i64, tpu.core_type = #tpu.core_type<tc>, window_params = [{transform_indices = @transform_0, window_bounds = array<i64: 16, 128>}, {pipeline_mode = #tpu.pipeline_mode<synchronous>, transform_indices = @transform_1, window_bounds = array<i64: 128, 128>}, {pipeline_mode = #tpu.pipeline_mode<synchronous>, transform_indices = @transform_2, window_bounds = array<i64: 1, 128>}, {pipeline_mode = #tpu.pipeline_mode<synchronous>, transform_indices = @transform_3, window_bounds = array<i64: 128, 128>}, {pipeline_mode = #tpu.pipeline_mode<synchronous>, transform_indices = @transform_4, window_bounds = array<i64: 1, 128>}, {transform_indices = @transform_5, window_bounds = array<i64: 16, 128>}, {transform_indices = @transform_6, window_bounds = array<i64: 16, 128>}]} {
    %c0 = arith.constant 0 : index
    %c0_0 = arith.constant 0 : index
    %0 = vector.load %arg1[%c0, %c0_0] : memref<16x128xf32, #tpu.memory_space<vmem>>, vector<16x128xf32>
    %c0_1 = arith.constant 0 : index
    %c0_2 = arith.constant 0 : index
    %1 = vector.load %arg2[%c0_1, %c0_2] : memref<128x128xf32, #tpu.memory_space<vmem>>, vector<128x128xf32>
    %cst = arith.constant dense<0.000000e+00> : vector<16x128xf32>
    %2 = tpu.matmul %0, %1, %cst {dimension_numbers = #tpu.dot_dimension_numbers<[1], [0], [0], [1], [0, 0, 1, 1], [], []>, precision = #tpu.contract_precision<fp32>} : vector<16x128xf32>, vector<128x128xf32>, vector<16x128xf32> -> vector<16x128xf32>
    %c0_3 = arith.constant 0 : index
    %c0_4 = arith.constant 0 : index
    %3 = vector.load %arg3[%c0_3, %c0_4] : memref<1x128xf32, #tpu.memory_space<vmem>>, vector<1x128xf32>
    %4 = vector.broadcast %3 : vector<1x128xf32> to vector<16x128xf32>
    %5 = arith.addf %2, %4 : vector<16x128xf32>
    %6 = arith.negf %5 : vector<16x128xf32>
    %7 = math.exp %6 : vector<16x128xf32>
    %cst_5 = arith.constant 1.000000e+00 : f32
    %8 = vector.broadcast %cst_5 : f32 to vector<16x128xf32>
    %9 = arith.addf %8, %7 : vector<16x128xf32>
    %10 = arith.divf %8, %9 : vector<16x128xf32>
    %c0_6 = arith.constant 0 : index
    %c0_7 = arith.constant 0 : index
    %11 = vector.load %arg6[%c0_6, %c0_7] : memref<16x128xf32, #tpu.memory_space<vmem>>, vector<16x128xf32>
    tpu.vector_store %arg6[%c0_6, %c0_7], %10 {strides = array<i32>} : memref<16x128xf32, #tpu.memory_space<vmem>>, vector<16x128xf32>,
    %c0_8 = arith.constant 0 : index
    %c0_9 = arith.constant 0 : index
    %12 = vector.load %arg4[%c0_8, %c0_9] : memref<128x128xf32, #tpu.memory_space<vmem>>, vector<128x128xf32>
    %cst_10 = arith.constant dense<0.000000e+00> : vector<16x128xf32>
    %13 = tpu.matmul %10, %12, %cst_10 {dimension_numbers = #tpu.dot_dimension_numbers<[1], [0], [0], [1], [0, 0, 1, 1], [], []>, precision = #tpu.contract_precision<fp32>} : vector<16x128xf32>, vector<128x128xf32>, vector<16x128xf32> -> vector<16x128xf32>
    %c0_11 = arith.constant 0 : index
    %c0_12 = arith.constant 0 : index
    %14 = vector.load %arg5[%c0_11, %c0_12] : memref<1x128xf32, #tpu.memory_space<vmem>>, vector<1x128xf32>
    %15 = vector.broadcast %14 : vector<1x128xf32> to vector<16x128xf32>
    %16 = arith.addf %13, %15 : vector<16x128xf32>
    %c0_13 = arith.constant 0 : index
    %c0_14 = arith.constant 0 : index
    %17 = vector.load %arg7[%c0_13, %c0_14] : memref<16x128xf32, #tpu.memory_space<vmem>>, vector<16x128xf32>
    tpu.vector_store %arg7[%c0_13, %c0_14], %16 {strides = array<i32>} : memref<16x128xf32, #tpu.memory_space<vmem>>, vector<16x128xf32>,
    return
  }
  func.func @transform_0(%arg0: i32) -> (i32, i32) {
    %c0_i32 = arith.constant 0 : i32
    %c0_i32_0 = arith.constant 0 : i32
    return %arg0, %c0_i32 : i32, i32
  }
  func.func @transform_1(%arg0: i32) -> (i32, i32) {
    %c0_i32 = arith.constant 0 : i32
    %c0_i32_0 = arith.constant 0 : i32
    %c0_i32_1 = arith.constant 0 : i32
    return %c0_i32, %c0_i32_0 : i32, i32
  }
  func.func @transform_2(%arg0: i32) -> (i32, i32) {
    %c0_i32 = arith.constant 0 : i32
    %c0_i32_0 = arith.constant 0 : i32
    %c0_i32_1 = arith.constant 0 : i32
    return %c0_i32, %c0_i32_0 : i32, i32
  }
  func.func @transform_3(%arg0: i32) -> (i32, i32) {
    %c0_i32 = arith.constant 0 : i32
    %c0_i32_0 = arith.constant 0 : i32
    %c0_i32_1 = arith.constant 0 : i32
    return %c0_i32, %c0_i32_0 : i32, i32
  }
  func.func @transform_4(%arg0: i32) -> (i32, i32) {
    %c0_i32 = arith.constant 0 : i32
    %c0_i32_0 = arith.constant 0 : i32
    %c0_i32_1 = arith.constant 0 : i32
    return %c0_i32, %c0_i32_0 : i32, i32
  }
  func.func @transform_5(%arg0: i32) -> (i32, i32) {
    %c0_i32 = arith.constant 0 : i32
    %c0_i32_0 = arith.constant 0 : i32
    return %arg0, %c0_i32 : i32, i32
  }
  func.func @transform_6(%arg0: i32) -> (i32, i32) {
    %c0_i32 = arith.constant 0 : i32
    %c0_i32_0 = arith.constant 0 : i32
    return %arg0, %c0_i32 : i32, i32
  }
}

</mosaic_0001>

<bundles_post_ra>
// kernel: tpu_custom_call.1
= control target key start
LH: loop header
LB: loop body
LE: loop exit
PB: predicated region body
PF: predicated region fallthrough
CT: control target
= control target key end

     0   :  { %12 = vsyncpa [#allocation3], 0  ;;  %s3365_s0 = inlined_call_operand.hbm [shape: f32[16,128], index: 0, kind: input, shape index: {}]   ;;  %s3366_s1 = inlined_call_operand.hbm [shape: f32[128,128], index: 1, kind: input, shape index: {}]   ;;  %s3367_s2 = inlined_call_operand.vmem [shape: f32[1,128], index: 2, kind: input, shape index: {}]   ;;  %s3368_s3 = inlined_call_operand.hbm [shape: f32[128,128], index: 3, kind: input, shape index: {}]   ;;  %s3369_s4 = inlined_call_operand.vmem [shape: f32[1,128], index: 4, kind: input, shape index: {}]   ;;  %s3370_s5 = inlined_call_operand.hbm [shape: f32[16,128], index: 5, kind: output, shape index: {0}]   ;;  %s3371_s6 = inlined_call_operand.hbm [shape: f32[16,128], index: 6, kind: output, shape index: {1}]  }
   0x1   :  { %13 = vsyncpa [#allocation6], 0 }
   0x2   :  { %14 = vsyncpa [#allocation4], 0 }
   0x3   :  { %15 = vsyncpa [#allocation10], 0  ;;  %s2712_s21 = smov [#allocation5]   ;;  %s2713_s23 = smov [#allocation2]  }
   0x4   :  { %s33_s22 = sshll.u32 %s2712_s21, 4  ;;  %s21_s24 = sshll.u32 %s2713_s23, 4  ;;  %s34_s22 = int_to_ptr.vmem [resolvable:$true] %s33_s22  ;;  %s2754_s24 = int_to_ptr.vmem [resolvable:$true] %s21_s24 }
   0x5   :  { %s2594_s27 = scalar_lea.hbm %s3366_s1, 2048 }
   0x6   :  { %p2595_p0 = scmp.ne.s32.totalorder %s3366_s1, %s2594_s27  ;;  %p2598_p1 = scmp.lt.u32.totalorder %s2594_s27, %s3366_s1 }
   0x8   :  { %p2600_p2 = pnand %p2598_p1, %p2595_p0 }
   0xa   :  { %2603 = shalt.err (!%p2600_p2)
}
   0xb   :  { %s2604_s8 = scalar_lea.vmem %s34_s22, 2048  ;;  %p2609_p4 = scmp.lt.s32.totalorder %s34_s22, %s34_s22 }
   0xc   :  { %p2605_p3 = scmp.ne.s32.totalorder %s34_s22, %s2604_s8  ;;  %p2610_p5 = scmp.lt.s32.totalorder %s2604_s8, %s2604_s8 }
   0xe   :  { %p2611_p6 = por %p2610_p5, %p2609_p4 }
  0x10   :  { %p2612_p7 = pnand %p2611_p6, %p2605_p3 }
  0x12   :  { %2615 = shalt.err (!%p2612_p7)
}
  0x13   :  { %s2714_s9 = smov 128   ;;  %s2715_s10 = smov 8  }
  0x14   :  { %39 = dma.hbm_to_vmem [thread:$0]  %s3366_s1, 2048, %s34_s22, [#allocation6], %s2714_s9, %s2714_s9, %s2715_s10  }
  0x15   :  { %s2616_s15 = scalar_lea.hbm %s3365_s0, 256 }
  0x16   :  { %p2617_p8 = scmp.ne.s32.totalorder %s3365_s0, %s2616_s15  ;;  %p2620_p9 = scmp.lt.u32.totalorder %s2616_s15, %s3365_s0 }
  0x18   :  { %p2622_p10 = pnand %p2620_p9, %p2617_p8 }
  0x1a   :  { %2625 = shalt.err (!%p2622_p10)
}
  0x1b   :  { %s2626_s20 = scalar_lea.vmem %s2754_s24, 256  ;;  %p2631_p12 = scmp.lt.s32.totalorder %s2754_s24, %s2754_s24 }
  0x1c   :  { %p2627_p11 = scmp.ne.s32.totalorder %s2754_s24, %s2626_s20  ;;  %p2632_p13 = scmp.lt.s32.totalorder %s2626_s20, %s2626_s20 }
  0x1e   :  { %p2633_p0 = por %p2632_p13, %p2631_p12 }
  0x20   :  { %p2634_p1 = pnand %p2633_p0, %p2627_p11 }
  0x22   :  { %2637 = shalt.err (!%p2634_p1)
}
  0x23   :  { %27 = dma.hbm_to_vmem [thread:$0]  %s3365_s0, 256, %s2754_s24, [#allocation3], %s2714_s9, %s2714_s9, %s2715_s10  }
  0x24   :  { %s2716_s22 = smov [#allocation7]   ;;  %s2638_s27 = scalar_lea.hbm %s3368_s3, 2048 }
  0x25   :  { %s47_s23 = sshll.u32 %s2716_s22, 4  ;;  %p2639_p2 = scmp.ne.s32.totalorder %s3368_s3, %s2638_s27  ;;  %s48_s23 = int_to_ptr.vmem [resolvable:$true] %s47_s23 }
  0x26   :  { %p2642_p3 = scmp.lt.u32.totalorder %s2638_s27, %s3368_s3 }
  0x28   :  { %p2644_p4 = pnand %p2642_p3, %p2639_p2 }
  0x2a   :  { %2647 = shalt.err (!%p2644_p4)
}
  0x2b   :  { %s2648_s8 = scalar_lea.vmem %s48_s23, 2048  ;;  %p2653_p6 = scmp.lt.s32.totalorder %s48_s23, %s48_s23 }
  0x2c   :  { %p2649_p5 = scmp.ne.s32.totalorder %s48_s23, %s2648_s8  ;;  %p2654_p7 = scmp.lt.s32.totalorder %s2648_s8, %s2648_s8 }
  0x2e   :  { %p2655_p8 = por %p2654_p7, %p2653_p6 }
  0x30   :  { %p2656_p9 = pnand %p2655_p8, %p2649_p5 }
  0x32   :  { %2659 = shalt.err (!%p2656_p9)
}
  0x33   :  { %53 = dma.hbm_to_vmem [thread:$0]  %s3368_s3, 2048, %s48_s23, [#allocation6], %s2714_s9, %s2714_s9, %s2715_s10  }
  0x34   :  { %2704 = dma.done.wait [#allocation3], 256  }
  0x35   :  { %2705 = vsyncadd [#allocation3], 4294967040 }
  0x36   :  { %2706 = dma.done.wait [#allocation6], 4096  }
  0x37   :  { %2707 = vsyncadd [#allocation6], 4294963200  ;;  %v67_v0 = vld [vmem:[#allocation5] sm:$0xff]  ;;  %v68_v1 = vld [vmem:[#allocation5 + $0x8] sm:$0xff] }
  0x38   :  { %v69_v2 = vld [vmem:[#allocation5 + $0x10] sm:$0xff]  ;;  %v91_v3 = vand.u32 4294901760, %v67_v0  ;;  %v94_v4 = vand.u32 4294901760, %v68_v1  ;;  %v70_v5 = vld [vmem:[#allocation5 + $0x18] sm:$0xff]  ;;  %v71_v7 = vld [vmem:[#allocation5 + $0x20] sm:$0xff] }
  0x39   :  { %v97_v6 = vand.u32 4294901760, %v69_v2  ;;  %v72_v8 = vld [vmem:[#allocation5 + $0x28] sm:$0xff]  ;;  %v100_v9 = vand.u32 4294901760, %v70_v5  ;;  %v103_v11 = vand.u32 4294901760, %v71_v7  ;;  %v2810_v14 = vld [vmem:[#allocation5 + $0x30] sm:$0xff]  ;;  %v2812_v15 = vld [vmem:[#allocation5 + $0x38] sm:$0xff] }
  0x3a   :  { %v2806_v10 = vpack.c.bf16 %v94_v4, %v91_v3  ;;  %v106_v12 = vand.u32 4294901760, %v72_v8  ;;  %v65_v16 = vld [vmem:[#allocation2] sm:$0xff]  ;;  %v109_v19 = vand.u32 4294901760, %v2810_v14  ;;  %v112_v20 = vand.u32 4294901760, %v2812_v15  ;;  %v75_v21 = vld [vmem:[#allocation5 + $0x40] sm:$0xff]  ;;  %v76_v22 = vld [vmem:[#allocation5 + $0x48] sm:$0xff] }
  0x3b   :  { %v2808_v13 = vpack.c.bf16 %v100_v9, %v97_v6  ;;  %v2816_v17 = vand.u32 4294901760, %v65_v16  ;;  %v2828_v25 = vsub.f32 %v67_v0, %v91_v3  ;;  %v115_v27 = vand.u32 4294901760, %v75_v21  ;;  %v66_v29 = vld [vmem:[#allocation2 + $0x8] sm:$0xff]  ;;  %v77_v30 = vld [vmem:[#allocation5 + $0x50] sm:$0xff]  ;;  %v79_v33 = vld [vmem:[#allocation5 + $0x60] sm:$0xff] }
  0x3c   :  { %2172 = vmatprep.subr.bf16.mxu0 %v2806_v10  ;;  %v2819_v18 = vpack.c.bf16 %v106_v12, %v103_v11  ;;  %v2831_v26 = vpack.c.bf16 %v112_v20, %v109_v19  ;;  %v118_v28 = vand.u32 4294901760, %v76_v22  ;;  %v78_v31 = vld [vmem:[#allocation5 + $0x58] sm:$0xff]  ;;  %v80_v34 = vld [vmem:[#allocation5 + $0x68] sm:$0xff]  ;;  %v81_v35 = vld [vmem:[#allocation5 + $0x70] sm:$0xff]  ;;  %v2836_v36 = vsub.f32 %v68_v1, %v94_v4 }
  0x3d   :  { %2174 = vmatpush3.bf16.msra.mxu0 %v2806_v10  ;;  %v2824_v23 = vsub.f32 %v65_v16, %v2816_v17  ;;  %v82_v37 = vld [vmem:[#allocation5 + $0x78] sm:$0xff]  ;;  %v194_v39 = vand.u32 4294901760, %v2828_v25  ;;  %v2840_v40 = vand.u32 4294901760, %v66_v29  ;;  %v2842_v41 = vsub.f32 %v69_v2, %v97_v6 }
  0x3e   :  { %2176 = vmatprep.subr.bf16.mxu0 %v2808_v13  ;;  %v2845_v42 = vpack.c.bf16 %v118_v28, %v115_v27  ;;  %v121_v43 = vand.u32 4294901760, %v77_v30  ;;  %v124_v44 = vand.u32 4294901760, %v78_v31  ;;  %v127_v45 = vand.u32 4294901760, %v79_v33 }
  0x3f   :  { %v173_v24 = vand.u32 4294901760, %v2824_v23  ;;  %v130_v46 = vand.u32 4294901760, %v80_v34  ;;  %v133_v47 = vand.u32 4294901760, %v81_v35  ;;  %v136_v48 = vand.u32 4294901760, %v82_v37 }
  0x40   :  { %v201_v49 = vand.u32 4294901760, %v2836_v36  ;;  %v2848_v50 = vsub.f32 %v70_v5, %v100_v9  ;;  %v2850_v51 = vsub.f32 %v71_v7, %v103_v11  ;;  %v195_v52 = vsub.f32 %v2828_v25, %v194_v39 }
  0x41   :  { %2178 = vmatpush3.bf16.msra.mxu0 %v2808_v13  ;;  %v174_v32 = vsub.f32 %v2824_v23, %v173_v24  ;;  %v2855_v53 = vsub.f32 %v66_v29, %v2840_v40  ;;  %v208_v54 = vand.u32 4294901760, %v2842_v41  ;;  %v2858_v55 = vsub.f32 %v72_v8, %v106_v12 }
  0x42   :  { %2180 = vmatprep.subr.bf16.mxu0 %v2819_v18  ;;  %v2861_v56 = vpack.c.bf16 %v124_v44, %v121_v43  ;;  %v2863_v57 = vpack.c.bf16 %v130_v46, %v127_v45  ;;  %v2865_v58 = vpack.c.bf16 %v136_v48, %v133_v47  ;;  %v202_v59 = vsub.f32 %v2836_v36, %v201_v49 }
  0x43   :  { %v175_v38 = vand.u32 4294901760, %v174_v32  ;;  %v215_v60 = vand.u32 4294901760, %v2848_v50  ;;  %v222_v61 = vand.u32 4294901760, %v2850_v51  ;;  %v196_v62 = vand.u32 4294901760, %v195_v52 }
  0x44   :  { %v183_v63 = vand.u32 4294901760, %v2855_v53  ;;  %v209_v0 = vsub.f32 %v2842_v41, %v208_v54  ;;  %v229_v1 = vand.u32 4294901760, %v2858_v55  ;;  %v2876_v2 = vsub.f32 %v2810_v14, %v109_v19 }
  0x45   :  { %2182 = vmatpush3.bf16.msra.mxu0 %v2819_v18  ;;  %1783 = vmatprep.mubr.f32.mxu0 %v175_v38  ;;  %v2879_v3 = vsub.f32 %v2812_v15, %v112_v20  ;;  %v2881_v4 = vsub.f32 %v75_v21, %v115_v27  ;;  %v2883_v5 = vsub.f32 %v76_v22, %v118_v28  ;;  %v203_v11 = vand.u32 4294901760, %v202_v59 }
  0x46   :  { %2184 = vmatprep.subr.bf16.mxu0 %v2831_v26  ;;  %v2885_v6 = vsub.f32 %v77_v30, %v121_v43  ;;  %v2887_v7 = vsub.f32 %v78_v31, %v124_v44  ;;  %v2889_v8 = vsub.f32 %v79_v33, %v127_v45  ;;  %v2891_v9 = vsub.f32 %v80_v34, %v130_v46 }
  0x47   :  { %v216_v12 = vsub.f32 %v2848_v50, %v215_v60  ;;  %v2894_v14 = vsub.f32 %v81_v35, %v133_v47  ;;  %v2896_v16 = vsub.f32 %v82_v37, %v136_v48  ;;  %v184_v15 = vsub.f32 %v2855_v53, %v183_v63 }
  0x48   :  { %v210_v19 = vand.u32 4294901760, %v209_v0  ;;  %v223_v20 = vsub.f32 %v2850_v51, %v222_v61  ;;  %v230_v21 = vsub.f32 %v2858_v55, %v229_v1  ;;  %v236_v22 = vand.u32 4294901760, %v2876_v2 }
  0x49   :  { %2186 = vmatpush3.bf16.msra.mxu0 %v2831_v26  ;;  %v243_v27 = vand.u32 4294901760, %v2879_v3  ;;  %v250_v28 = vand.u32 4294901760, %v2881_v4  ;;  %v257_v29 = vand.u32 4294901760, %v2883_v5  ;;  %v264_v30 = vand.u32 4294901760, %v2885_v6 }
  0x4a   :  { %2188 = vmatprep.subr.bf16.mxu0 %v2845_v42  ;;  %v271_v31 = vand.u32 4294901760, %v2887_v7  ;;  %v278_v32 = vand.u32 4294901760, %v2889_v8  ;;  %v285_v33 = vand.u32 4294901760, %v2891_v9  ;;  %v292_v34 = vand.u32 4294901760, %v2894_v14 }
  0x4b   :  { %v299_v35 = vand.u32 4294901760, %v2896_v16  ;;  %v2915_v37 = vpack.c.bf16 %v201_v49, %v194_v39  ;;  %v2917_v38 = vpack.c.bf16 %v215_v60, %v208_v54  ;;  %v2203_v43 = vpack.c.bf16 %v203_v11, %v196_v62 }
  0x4c   :  { %v2920_v44 = vpack.c.bf16 %v229_v1, %v222_v61  ;;  %v2922_v45 = vpack.c.bf16 %v243_v27, %v236_v22  ;;  %v2924_v46 = vpack.c.bf16 %v257_v29, %v250_v28  ;;  %v217_v47 = vand.u32 4294901760, %v216_v12 }
  0x4d   :  { %2190 = vmatpush3.bf16.msra.mxu0 %v2845_v42  ;;  %v2927_v48 = vpack.c.bf16 %v271_v31, %v264_v30  ;;  %v2929_v52 = vpack.c.bf16 %v285_v33, %v278_v32  ;;  %v2931_v39 = vpack.c.bf16 %v299_v35, %v292_v34  ;;  %v185_v49 = vand.u32 4294901760, %v184_v15 }
  0x4e   :  { %2192 = vmatprep.subr.bf16.mxu0 %v2861_v56  ;;  %v224_v54 = vand.u32 4294901760, %v223_v20  ;;  %v231_v59 = vand.u32 4294901760, %v230_v21  ;;  %v2207_v60 = vpack.c.bf16 %v217_v47, %v210_v19  ;;  %v237_v61 = vsub.f32 %v2876_v2, %v236_v22 }
  0x4f   :  { %v244_v62 = vsub.f32 %v2879_v3, %v243_v27  ;;  %v251_v12 = vsub.f32 %v2881_v4, %v250_v28  ;;  %v258_v15 = vsub.f32 %v2883_v5, %v257_v29  ;;  %v265_v20 = vsub.f32 %v2885_v6, %v264_v30 }
  0x50   :  { %v2211_v0 = vpack.c.bf16 %v231_v59, %v224_v54  ;;  %v238_v1 = vand.u32 4294901760, %v237_v61  ;;  %v272_v27 = vsub.f32 %v2887_v7, %v271_v31  ;;  %v286_v28 = vsub.f32 %v2891_v9, %v285_v33 }
  0x51   :  { %2194 = vmatpush3.bf16.msra.mxu0 %v2861_v56  ;;  %v245_v11 = vand.u32 4294901760, %v244_v62  ;;  %v252_v21 = vand.u32 4294901760, %v251_v12  ;;  %v259_v22 = vand.u32 4294901760, %v258_v15  ;;  %v300_v61 = vsub.f32 %v2896_v16, %v299_v35  ;;  %v3068_v12 = vld [vmem:[#allocation7 + $0x70] sm:$0xff]  ;;  %v3070_v15 = vld [vmem:[#allocation7 + $0x78] sm:$0xff] }
  0x52   :  { %2196 = vmatprep.subr.bf16.mxu0 %v2863_v57  ;;  %v273_v54 = vand.u32 4294901760, %v272_v27  ;;  %v287_v30 = vand.u32 4294901760, %v286_v28  ;;  %v2235_v33 = vpack.c.bf16 %v2836_v36, %v2828_v25  ;;  %v2243_v35 = vpack.c.bf16 %v2858_v55, %v2850_v51  ;;  %v792_v55 = vld [vmem:[#allocation7 + $0x20] sm:$0xff] }
  0x53   :  { %v2215_v19 = vpack.c.bf16 %v245_v11, %v238_v1  ;;  %v2219_v47 = vpack.c.bf16 %v259_v22, %v252_v21  ;;  %v2247_v1 = vpack.c.bf16 %v2879_v3, %v2876_v2  ;;  %v2251_v25 = vpack.c.bf16 %v2883_v5, %v2881_v4  ;;  %v795_v2 = vld [vmem:[#allocation7 + $0x38] sm:$0xff] }
  0x54   :  { %v2255_v36 = vpack.c.bf16 %v2887_v7, %v2885_v6  ;;  %v833_v4 = vand.u32 4294901760, %v795_v2  ;;  %v3034_v6 = vld [vmem:[#allocation7 + $0x40] sm:$0xff]  ;;  %v3036_v7 = vld [vmem:[#allocation7 + $0x48] sm:$0xff]  ;;  %v854_v21 = vand.u32 4294901760, %v3068_v12  ;;  %v857_v22 = vand.u32 4294901760, %v3070_v15 }
  0x55   :  { %2198 = vmatpush3.bf16.msra.mxu0 %v2863_v57 }
  0x56   :  { %2200 = vmatprep.subr.bf16.mxu0 %v2865_v58 }
  0x59   :  { %2202 = vmatpush3.bf16.msra.mxu0 %v2865_v58 }
  0x5a   :  { %2204 = vmatprep.subr.bf16.mxu0 %v2203_v43 }
  0x5c   :  { %1784 = vmatmul.mubr.f32.vlgmr.msra.gmra.mrb[0].mxu0 %v185_v49  ;;  %v266_v49 = vand.u32 4294901760, %v265_v20 }
  0x5d   :  { %2206 = vmatpush3.bf16.msra.mxu0 %v2203_v43  ;;  %1818 = vmatprep.mubr.f32.mxu0 %v2816_v17  ;;  %v279_v43 = vsub.f32 %v2889_v8, %v278_v32  ;;  %v301_v32 = vand.u32 4294901760, %v300_v61 }
  0x5e   :  { %2208 = vmatprep.subr.bf16.mxu0 %v2207_v60  ;;  %v2223_v59 = vpack.c.bf16 %v273_v54, %v266_v49 }
  0x5f   :  { %v280_v29 = vand.u32 4294901760, %v279_v43 }
  0x61   :  { %2210 = vmatpush3.bf16.msra.mxu0 %v2207_v60  ;;  %v293_v60 = vsub.f32 %v2894_v14, %v292_v34  ;;  %v2227_v31 = vpack.c.bf16 %v287_v30, %v280_v29  ;;  %v2239_v34 = vpack.c.bf16 %v2848_v50, %v2842_v41  ;;  %v2259_v41 = vpack.c.bf16 %v2891_v9, %v2889_v8 }
  0x62   :  { %2212 = vmatprep.subr.bf16.mxu0 %v2211_v0  ;;  %v2263_v50 = vpack.c.bf16 %v2896_v16, %v2894_v14  ;;  %v836_v8 = vand.u32 4294901760, %v3034_v6  ;;  %v839_v9 = vand.u32 4294901760, %v3036_v7  ;;  %v3044_v16 = vld [vmem:[#allocation7 + $0x50] sm:$0xff] }
  0x63   :  { %v294_v62 = vand.u32 4294901760, %v293_v60 }
  0x64   :  { %v3042_v14 = vpack.c.bf16 %v839_v9, %v836_v8 }
  0x65   :  { %2214 = vmatpush3.bf16.msra.mxu0 %v2211_v0  ;;  %v2231_v0 = vpack.c.bf16 %v301_v32, %v294_v62 }
  0x66   :  { %2216 = vmatprep.subr.bf16.mxu0 %v2215_v19 }
  0x69   :  { %2218 = vmatpush3.bf16.msra.mxu0 %v2215_v19 }
  0x6a   :  { %2220 = vmatprep.subr.bf16.mxu0 %v2219_v47 }
  0x6d   :  { %2222 = vmatpush3.bf16.msra.mxu0 %v2219_v47  ;;  %v3086_v47 = vpack.c.bf16 %v857_v22, %v854_v21 }
  0x6e   :  { %2224 = vmatprep.subr.bf16.mxu0 %v2223_v59 }
  0x71   :  { %2226 = vmatpush3.bf16.msra.mxu0 %v2223_v59 }
  0x72   :  { %2228 = vmatprep.subr.bf16.mxu0 %v2227_v31 }
  0x75   :  { %2230 = vmatpush3.bf16.msra.mxu0 %v2227_v31 }
  0x76   :  { %2232 = vmatprep.subr.bf16.mxu0 %v2231_v0 }
  0x79   :  { %2234 = vmatpush3.bf16.msra.mxu0 %v2231_v0 }
  0x7a   :  { %2236 = vmatprep.subr.bf16.mxu0 %v2235_v33 }
  0x7c   :  { %1819 = vmatmul.mubr.f32.vlgmr.msra.gmra.mrb[0].mxu0 %v2840_v40 }
  0x7d   :  { %2238 = vmatpush3.bf16.msra.mxu0 %v2235_v33  ;;  %1853 = vmatprep.mubr.f32.mxu0 %v2824_v23 }
  0x7e   :  { %2240 = vmatprep.subr.bf16.mxu0 %v2239_v34 }
  0x81   :  { %2242 = vmatpush3.bf16.msra.mxu0 %v2239_v34 }
  0x82   :  { %2244 = vmatprep.subr.bf16.mxu0 %v2243_v35 }
  0x85   :  { %2246 = vmatpush3.bf16.msra.mxu0 %v2243_v35 }
  0x86   :  { %2248 = vmatprep.subr.bf16.mxu0 %v2247_v1 }
  0x89   :  { %2250 = vmatpush3.bf16.msra.mxu0 %v2247_v1 }
  0x8a   :  { %2252 = vmatprep.subr.bf16.mxu0 %v2251_v25 }
  0x8d   :  { %2254 = vmatpush3.bf16.msra.mxu0 %v2251_v25 }
  0x8e   :  { %2256 = vmatprep.subr.bf16.mxu0 %v2255_v36 }
  0x91   :  { %2258 = vmatpush3.bf16.msra.mxu0 %v2255_v36 }
  0x92   :  { %2260 = vmatprep.subr.bf16.mxu0 %v2259_v41 }
  0x95   :  { %2262 = vmatpush3.bf16.msra.mxu0 %v2259_v41 }
  0x96   :  { %2264 = vmatprep.subr.bf16.mxu0 %v2263_v50 }
  0x99   :  { %2266 = vmatpush3.bf16.msra.mxu0 %v2263_v50 }
  0x9a   :  { %2268 = vmatprep.subr.bf16.mxu0 %v2806_v10 }
  0x9c   :  { %1854 = vmatmul.mubr.f32.vlgmr.msra.gmra.mrb[0].mxu0 %v2855_v53 }
  0x9d   :  { %2270 = vmatpush3.bf16.msra.mxu0 %v2806_v10  ;;  %1888 = vmatprep.mubr.f32.mxu0 %v173_v24  ;;  %v790_v24 = vld [vmem:[#allocation7 + $0x10] sm:$0xff] }
  0x9e   :  { %2272 = vmatprep.subr.bf16.mxu0 %v2808_v13 }
  0xa1   :  { %2274 = vmatpush3.bf16.msra.mxu0 %v2808_v13 }
  0xa2   :  { %2276 = vmatprep.subr.bf16.mxu0 %v2819_v18 }
  0xa5   :  { %2278 = vmatpush3.bf16.msra.mxu0 %v2819_v18 }
  0xa6   :  { %2280 = vmatprep.subr.bf16.mxu0 %v2831_v26 }
  0xa9   :  { %2282 = vmatpush3.bf16.msra.mxu0 %v2831_v26 }
  0xaa   :  { %2284 = vmatprep.subr.bf16.mxu0 %v2845_v42 }
  0xad   :  { %2286 = vmatpush3.bf16.msra.mxu0 %v2845_v42 }
  0xae   :  { %2288 = vmatprep.subr.bf16.mxu0 %v2861_v56 }
  0xb1   :  { %2290 = vmatpush3.bf16.msra.mxu0 %v2861_v56 }
  0xb2   :  { %2292 = vmatprep.subr.bf16.mxu0 %v2863_v57 }
  0xb5   :  { %2294 = vmatpush3.bf16.msra.mxu0 %v2863_v57 }
  0xb6   :  { %2296 = vmatprep.subr.bf16.mxu0 %v2865_v58 }
  0xb9   :  { %2298 = vmatpush3.bf16.msra.mxu0 %v2865_v58 }
  0xba   :  { %2300 = vmatprep.subr.bf16.mxu0 %v2915_v37 }
  0xbc   :  { %1889 = vmatmul.mubr.f32.vlgmr.msra.gmra.mrb[0].mxu0 %v183_v63  ;;  %v794_v63 = vld [vmem:[#allocation7 + $0x30] sm:$0xff] }
  0xbd   :  { %2302 = vmatpush3.bf16.msra.mxu0 %v2915_v37  ;;  %1923 = vmatprep.mubr.f32.mxu0 %v2816_v17  ;;  %v830_v3 = vand.u32 4294901760, %v794_v63  ;;  %v3046_v37 = vld [vmem:[#allocation7 + $0x58] sm:$0xff] }
  0xbe   :  { %2304 = vmatprep.subr.bf16.mxu0 %v2917_v38 }
  0xbf   :  { %v3032_v5 = vpack.c.bf16 %v833_v4, %v830_v3 }
  0xc1   :  { %2306 = vmatpush3.bf16.msra.mxu0 %v2917_v38  ;;  %v842_v38 = vand.u32 4294901760, %v3044_v16 }
  0xc2   :  { %2308 = vmatprep.subr.bf16.mxu0 %v2920_v44 }
  0xc5   :  { %2310 = vmatpush3.bf16.msra.mxu0 %v2920_v44  ;;  %v845_v44 = vand.u32 4294901760, %v3046_v37 }
  0xc6   :  { %2312 = vmatprep.subr.bf16.mxu0 %v2922_v45 }
  0xc9   :  { %2314 = vmatpush3.bf16.msra.mxu0 %v2922_v45  ;;  %v3052_v45 = vpack.c.bf16 %v845_v44, %v842_v38 }
  0xca   :  { %2316 = vmatprep.subr.bf16.mxu0 %v2924_v46 }
  0xcd   :  { %2318 = vmatpush3.bf16.msra.mxu0 %v2924_v46  ;;  %v3054_v46 = vld [vmem:[#allocation7 + $0x60] sm:$0xff] }
  0xce   :  { %2320 = vmatprep.subr.bf16.mxu0 %v2927_v48 }
  0xd1   :  { %2322 = vmatpush3.bf16.msra.mxu0 %v2927_v48  ;;  %v3056_v48 = vld [vmem:[#allocation7 + $0x68] sm:$0xff] }
  0xd2   :  { %2324 = vmatprep.subr.bf16.mxu0 %v2929_v52 }
  0xd5   :  { %2326 = vmatpush3.bf16.msra.mxu0 %v2929_v52  ;;  %v848_v52 = vand.u32 4294901760, %v3054_v46 }
  0xd6   :  { %2328 = vmatprep.subr.bf16.mxu0 %v2931_v39 }
  0xd9   :  { %2330 = vmatpush3.bf16.msra.mxu0 %v2931_v39  ;;  %v851_v39 = vand.u32 4294901760, %v3056_v48 }
  0xda   :  { %2332 = vmatprep.subr.bf16.mxu0 %v2806_v10 }
  0xdb   :  { %v3066_v11 = vpack.c.bf16 %v851_v39, %v848_v52 }
  0xdc   :  { %1924 = vmatmul.mubr.f32.vlgmr.msra.gmra.mrb[0].mxu0 %v2840_v40 }
  0xdd   :  { %2334 = vmatpush3.bf16.msra.mxu0 %v2806_v10  ;;  %1958 = vmatprep.mubr.f32.mxu0 %v2816_v17  ;;  %v788_v10 = vld [vmem:[#allocation7] sm:$0xff] }
  0xde   :  { %2336 = vmatprep.subr.bf16.mxu0 %v2808_v13  ;;  %v812_v17 = vand.u32 4294901760, %v788_v10 }
  0xe0   :  { %v3072_v20 = vsub.f32 %v788_v10, %v812_v17  ;;  %v3125_v10 = vsub.f32 %v794_v63, %v830_v3 }
  0xe1   :  { %2338 = vmatpush3.bf16.msra.mxu0 %v2808_v13  ;;  %v789_v13 = vld [vmem:[#allocation7 + $0x8] sm:$0xff] }
  0xe2   :  { %2340 = vmatprep.subr.bf16.mxu0 %v2819_v18  ;;  %v915_v27 = vand.u32 4294901760, %v3072_v20 }
  0xe4   :  { %v916_v49 = vsub.f32 %v3072_v20, %v915_v27 }
  0xe5   :  { %2342 = vmatpush3.bf16.msra.mxu0 %v2819_v18  ;;  %v815_v18 = vand.u32 4294901760, %v789_v13 }
  0xe6   :  { %2344 = vmatprep.subr.bf16.mxu0 %v2831_v26  ;;  %v917_v59 = vand.u32 4294901760, %v916_v49 }
  0xe7   :  { %v3020_v23 = vpack.c.bf16 %v815_v18, %v812_v17  ;;  %v3074_v19 = vsub.f32 %v789_v13, %v815_v18  ;;  %v3127_v13 = vsub.f32 %v795_v2, %v833_v4 }
  0xe9   :  { %2346 = vmatpush3.bf16.msra.mxu0 %v2831_v26  ;;  %v791_v26 = vld [vmem:[#allocation7 + $0x18] sm:$0xff]  ;;  %2364 = vmatprep.subr.bf16.mxu1 %v3020_v23  ;;  %v922_v43 = vand.u32 4294901760, %v3074_v19 }
  0xea   :  { %2348 = vmatprep.subr.bf16.mxu0 %v2845_v42  ;;  %v821_v51 = vand.u32 4294901760, %v791_v26  ;;  %2366 = vmatpush3.bf16.msra.mxu1 %v3020_v23 }
  0xeb   :  { %v923_v54 = vsub.f32 %v3074_v19, %v922_v43 }
  0xec   :  { %v3097_v29 = vsub.f32 %v791_v26, %v821_v51  ;;  %v964_v26 = vand.u32 4294901760, %v3127_v13 }
  0xed   :  { %2350 = vmatpush3.bf16.msra.mxu0 %v2845_v42  ;;  %v818_v42 = vand.u32 4294901760, %v790_v24  ;;  %v924_v30 = vand.u32 4294901760, %v923_v54 }
  0xee   :  { %2352 = vmatprep.subr.bf16.mxu0 %v2861_v56  ;;  %v936_v61 = vand.u32 4294901760, %v3097_v29 }
  0xef   :  { %v3024_v53 = vpack.c.bf16 %v821_v51, %v818_v42  ;;  %v3095_v28 = vsub.f32 %v790_v24, %v818_v42  ;;  %v3102_v31 = vpack.c.bf16 %v924_v30, %v917_v59  ;;  %v957_v24 = vand.u32 4294901760, %v3125_v10 }
  0xf0   :  { %v937_v32 = vsub.f32 %v3097_v29, %v936_v61 }
  0xf1   :  { %2354 = vmatpush3.bf16.msra.mxu0 %v2861_v56  ;;  %v793_v56 = vld [vmem:[#allocation7 + $0x28] sm:$0xff]  ;;  %2368 = vmatprep.subr.bf16.mxu1 %v3024_v53  ;;  %v929_v60 = vand.u32 4294901760, %v3095_v28  ;;  %v958_v51 = vsub.f32 %v3125_v10, %v957_v24 }
  0xf2   :  { %2356 = vmatprep.subr.bf16.mxu0 %v2863_v57  ;;  %2370 = vmatpush3.bf16.msra.mxu1 %v3024_v53  ;;  %v938_v35 = vand.u32 4294901760, %v937_v32 }
  0xf3   :  { %v930_v62 = vsub.f32 %v3095_v28, %v929_v60 }
  0xf5   :  { %2358 = vmatpush3.bf16.msra.mxu0 %v2863_v57  ;;  %v827_v57 = vand.u32 4294901760, %v793_v56  ;;  %v931_v34 = vand.u32 4294901760, %v930_v62 }
  0xf6   :  { %2360 = vmatprep.subr.bf16.mxu0 %v2865_v58 }
  0xf7   :  { %v3112_v33 = vsub.f32 %v793_v56, %v827_v57  ;;  %v3117_v36 = vpack.c.bf16 %v938_v35, %v931_v34  ;;  %v3140_v56 = vsub.f32 %v3036_v7, %v839_v9  ;;  %v3154_v7 = vsub.f32 %v3044_v16, %v842_v38 }
  0xf8   :  { %v3179_v38 = vsub.f32 %v3056_v48, %v851_v39  ;;  %v3196_v48 = vsub.f32 %v3070_v15, %v857_v22 }
  0xf9   :  { %2362 = vmatpush3.bf16.msra.mxu0 %v2865_v58  ;;  %v950_v25 = vand.u32 4294901760, %v3112_v33  ;;  %v3378_v2 = vand.u32 4294901760, %v3140_v56  ;;  %v3377_v59 = vand.u32 4294901760, %v3154_v7 }
  0xfb   :  { %v951_v50 = vsub.f32 %v3112_v33, %v950_v25  ;;  %v986_v32 = vsub.f32 %v3154_v7, %v3377_v59 }
  0xfc   :  { %1959 = vmatmul.mubr.f32.vlgmr.msra.gmra.mrb[0].mxu0 %v2840_v40  ;;  %v824_v40 = vand.u32 4294901760, %v792_v55 }
  0xfd   :  { %v952_v18 = vand.u32 4294901760, %v951_v50 }
  0xfe   :  { %v3028_v58 = vpack.c.bf16 %v827_v57, %v824_v40  ;;  %v3110_v0 = vsub.f32 %v792_v55, %v824_v40  ;;  %v3137_v55 = vsub.f32 %v3034_v6, %v836_v8  ;;  %v965_v40 = vsub.f32 %v3127_v13, %v964_v26 }
  0xff   :  { %v959_v57 = vand.u32 4294901760, %v958_v51  ;;  %v979_v6 = vsub.f32 %v3140_v56, %v3378_v2  ;;  %v3157_v8 = vsub.f32 %v3046_v37, %v845_v44  ;;  %v3174_v37 = vsub.f32 %v3054_v46, %v848_v52 }
 0x100   :  { %2372 = vmatprep.subr.bf16.mxu1 %v3028_v58  ;;  %v943_v1 = vand.u32 4294901760, %v3110_v0  ;;  %v971_v63 = vand.u32 4294901760, %v3137_v55  ;;  %v966_v3 = vand.u32 4294901760, %v965_v40  ;;  %v987_v44 = vand.u32 4294901760, %v986_v32 }
 0x101   :  { %2374 = vmatpush3.bf16.msra.mxu1 %v3028_v58  ;;  %v980_v54 = vand.u32 4294901760, %v979_v6  ;;  %v3376_v30 = vand.u32 4294901760, %v3157_v8  ;;  %v3375_v35 = vand.u32 4294901760, %v3174_v37  ;;  %v3191_v46 = vsub.f32 %v3068_v12, %v854_v21 }
 0x102   :  { %2376 = vmatprep.subr.bf16.mxu1 %v3032_v5  ;;  %v944_v41 = vsub.f32 %v3110_v0, %v943_v1  ;;  %v972_v4 = vsub.f32 %v3137_v55, %v971_v63  ;;  %v3159_v9 = vpack.c.bf16 %v966_v3, %v959_v57  ;;  %v3372_v51 = vand.u32 4294901760, %v3196_v48 }
 0x103   :  { %v993_v16 = vsub.f32 %v3157_v8, %v3376_v30  ;;  %v2431_v6 = vpack.c.bf16 %v3097_v29, %v3095_v28  ;;  %v2443_v32 = vpack.c.bf16 %v3140_v56, %v3137_v55  ;;  %v3380_v28 = vand.u32 4294901760, %v3154_v7 }
 0x104   :  { %v945_v17 = vand.u32 4294901760, %v944_v41  ;;  %v973_v49 = vand.u32 4294901760, %v972_v4  ;;  %v3374_v41 = vand.u32 4294901760, %v3179_v38  ;;  %v1021_v21 = vsub.f32 %v3196_v48, %v3372_v51 }
 0x105   :  { %2378 = vmatpush3.bf16.msra.mxu1 %v3032_v5  ;;  %v994_v34 = vand.u32 4294901760, %v993_v16  ;;  %v2427_v4 = vpack.c.bf16 %v3074_v19, %v3072_v20  ;;  %v2447_v16 = vpack.c.bf16 %v3157_v8, %v3154_v7  ;;  %v2499_v20 = vpack.c.bf16 %v950_v25, %v943_v1 }
 0x106   :  { %2380 = vmatprep.subr.bf16.mxu1 %v3042_v14  ;;  %v3131_v42 = vpack.c.bf16 %v952_v18, %v945_v17  ;;  %v3163_v62 = vpack.c.bf16 %v980_v54, %v973_v49  ;;  %v1000_v17 = vsub.f32 %v3174_v37, %v3375_v35  ;;  %v1007_v52 = vsub.f32 %v3179_v38, %v3374_v41 }
 0x107   :  { %v3183_v50 = vpack.c.bf16 %v994_v34, %v987_v44  ;;  %v3373_v18 = vand.u32 4294901760, %v3191_v46  ;;  %v1022_v57 = vand.u32 4294901760, %v1021_v21  ;;  %v2435_v49 = vpack.c.bf16 %v3112_v33, %v3110_v0 }
 0x108   :  { %v1001_v39 = vand.u32 4294901760, %v1000_v17  ;;  %v1008_v40 = vand.u32 4294901760, %v1007_v52  ;;  %v2439_v54 = vpack.c.bf16 %v3127_v13, %v3125_v10  ;;  %v3223_v44 = vpack.c.bf16 %v3179_v38, %v3174_v37  ;;  %v1531_v17 = vld [vmem:[%s3367_s2] ss:$0 sm:$0xff]  ;;  %s2717_s2 = smov [#allocation8]  }
 0x109   :  { %2382 = vmatpush3.bf16.msra.mxu1 %v3042_v14  ;;  %v1014_v12 = vsub.f32 %v3191_v46, %v3373_v18  ;;  %v3227_v34 = vpack.c.bf16 %v3196_v48, %v3191_v46  ;;  %v2503_v19 = vpack.c.bf16 %v964_v26, %v957_v24  ;;  %v3381_v29 = vand.u32 4294901760, %v3157_v8  ;;  %s1502_s12 = sshll.u32 %s2717_s2, 4  ;;  %s1503_s12 = int_to_ptr.vmem [resolvable:$true] %s1502_s12 }
 0x10a   :  { %2384 = vmatprep.subr.bf16.mxu1 %v3052_v45  ;;  %v2419_v15 = vpack.c.bf16 %v1008_v40, %v1001_v39  ;;  %v3383_v0 = vand.u32 4294901760, %v3179_v38  ;;  %v3384_v1 = vand.u32 4294901760, %v3191_v46  ;;  %v3385_v25 = vand.u32 4294901760, %v3196_v48  ;;  %s2660_s13 = scalar_lea.vmem %s1503_s12, 256  ;;  %p2665_p11 = scmp.lt.s32.totalorder %s1503_s12, %s1503_s12 }
 0x10b   :  { %v1015_v22 = vand.u32 4294901760, %v1014_v12  ;;  %p2661_p10 = scmp.ne.s32.totalorder %s1503_s12, %s2660_s13  ;;  %p2666_p12 = scmp.lt.s32.totalorder %s2660_s13, %s2660_s13 }
 0x10c   :  { %v2519_v10 = vpack.c.bf16 %v3385_v25, %v3384_v1 }
 0x10d   :  { %2386 = vmatpush3.bf16.msra.mxu1 %v3052_v45  ;;  %v2423_v3 = vpack.c.bf16 %v1022_v57, %v1015_v22  ;;  %p2667_p13 = por %p2666_p12, %p2665_p11 }
 0x10e   :  { %2388 = vmatprep.subr.bf16.mxu1 %v3066_v11 }
 0x10f   :  { %p2668_p0 = pnand %p2667_p13, %p2661_p10 }
 0x111   :  { %2390 = vmatpush3.bf16.msra.mxu1 %v3066_v11 }
 0x112   :  { %2392 = vmatprep.subr.bf16.mxu1 %v3086_v47 }
 0x115   :  { %2394 = vmatpush3.bf16.msra.mxu1 %v3086_v47 }
 0x116   :  { %2396 = vmatprep.subr.bf16.mxu1 %v3102_v31 }
 0x1cf   :  { %v1960_v52 = vpop.f32.mrb[0].mxu0 }
 0x1d0   :  { %v2555_v39 = vadd.f32 %v1960_v52, %v1531_v17  ;;  %v764_v40 = vpop.f32.mrb[1].mxu0 }
 0x1d1   :  { %v2556_v12 = vadd.f32 %v1531_v17, %v764_v40 }
 0x1d2   :  { %v1533_v21 = vmul.f32 -1.442695, %v2555_v39 }
 0x1d3   :  { %v1532_v22 = vmul.f32 -1.442695, %v2556_v12 }
 0x1d4   :  { %2586 = vpow2.f32 %v1533_v21 }
 0x1d5   :  { %2588 = vpow2.f32 %v1532_v22 }
 0x1de   :  { %v2587_v57 = vpop.eup %2586 }
 0x1df   :  { %v2589_v51 = vpop.eup %2588  ;;  %v781_v18 = vadd.f32 1.0, %v2587_v57 }
 0x1e0   :  { %v780_v41 = vadd.f32 1.0, %v2589_v51 }
 0x1e1   :  { %2590 = vrcp.f32 %v781_v18 }
 0x1e2   :  { %2592 = vrcp.f32 %v780_v41 }
 0x1eb   :  { %v2591_v35 = vpop.eup %2590 }
 0x1ec   :  { %v2593_v30 = vpop.eup %2592  ;;  %787 = vst [vmem:[#allocation8 + $0x8] sm:$0xff] %v2591_v35  ;;  %v3232_v59 = vand.u32 4294901760, %v2591_v35 }
 0x1ed   :  { %786 = vst [vmem:[#allocation8] sm:$0xff] %v2593_v30  ;;  %v3234_v2 = vand.u32 4294901760, %v2593_v30 }
 0x1ee   :  { %v3237_v17 = vsub.f32 %v2591_v35, %v3232_v59 }
 0x1ef   :  { %v893_v52 = vsub.f32 %v2593_v30, %v3234_v2 }
 0x1f0   :  { %v904_v39 = vand.u32 4294901760, %v3237_v17 }
 0x1f1   :  { %v894_v40 = vand.u32 4294901760, %v893_v52 }
 0x1f2   :  { %v905_v41 = vsub.f32 %v3237_v17, %v904_v39 }
 0x1f3   :  { %v895_v18 = vsub.f32 %v893_v52, %v894_v40 }
 0x1f4   :  { %v906_v12 = vand.u32 4294901760, %v905_v41 }
 0x1f5   :  { %v896_v51 = vand.u32 4294901760, %v895_v18 }
 0x1f7   :  { %1993 = vmatprep.mubr.f32.mxu1 %v896_v51 }
 0x1f8   :  { %1994 = vmatmul.mubr.f32.vlgmr.msra.gmra.mrb[0].mxu1 %v906_v12 }
 0x1f9   :  { %2398 = vmatpush3.bf16.msra.mxu1 %v3102_v31  ;;  %2028 = vmatprep.mubr.f32.mxu1 %v3234_v2  ;;  %v2491_v31 = vpack.c.bf16 %v922_v43, %v915_v27  ;;  %v3379_v27 = vand.u32 4294901760, %v3140_v56 }
 0x1fa   :  { %2400 = vmatprep.subr.bf16.mxu1 %v3117_v36 }
 0x1fb   :  { %v2507_v43 = vpack.c.bf16 %v3379_v27, %v971_v63 }
 0x1fd   :  { %2402 = vmatpush3.bf16.msra.mxu1 %v3117_v36  ;;  %v2495_v36 = vpack.c.bf16 %v936_v61, %v929_v60  ;;  %v2511_v60 = vpack.c.bf16 %v3381_v29, %v3380_v28  ;;  %v3382_v61 = vand.u32 4294901760, %v3174_v37 }
 0x1fe   :  { %2404 = vmatprep.subr.bf16.mxu1 %v3131_v42 }
 0x1ff   :  { %v2515_v33 = vpack.c.bf16 %v3383_v0, %v3382_v61 }
 0x201   :  { %2406 = vmatpush3.bf16.msra.mxu1 %v3131_v42 }
 0x202   :  { %2408 = vmatprep.subr.bf16.mxu1 %v3159_v9 }
 0x205   :  { %2410 = vmatpush3.bf16.msra.mxu1 %v3159_v9 }
 0x206   :  { %2412 = vmatprep.subr.bf16.mxu1 %v3163_v62 }
 0x209   :  { %2414 = vmatpush3.bf16.msra.mxu1 %v3163_v62 }
 0x20a   :  { %2416 = vmatprep.subr.bf16.mxu1 %v3183_v50 }
 0x20d   :  { %2418 = vmatpush3.bf16.msra.mxu1 %v3183_v50 }
 0x20e   :  { %2420 = vmatprep.subr.bf16.mxu1 %v2419_v15 }
 0x211   :  { %2422 = vmatpush3.bf16.msra.mxu1 %v2419_v15 }
 0x212   :  { %2424 = vmatprep.subr.bf16.mxu1 %v2423_v3 }
 0x215   :  { %2426 = vmatpush3.bf16.msra.mxu1 %v2423_v3 }
 0x216   :  { %2428 = vmatprep.subr.bf16.mxu1 %v2427_v4 }
 0x218   :  { %2029 = vmatmul.mubr.f32.vlgmr.msra.gmra.mrb[0].mxu1 %v3232_v59 }
 0x219   :  { %2430 = vmatpush3.bf16.msra.mxu1 %v2427_v4  ;;  %2063 = vmatprep.mubr.f32.mxu1 %v893_v52 }
 0x21a   :  { %2432 = vmatprep.subr.bf16.mxu1 %v2431_v6 }
 0x21d   :  { %2434 = vmatpush3.bf16.msra.mxu1 %v2431_v6 }
 0x21e   :  { %2436 = vmatprep.subr.bf16.mxu1 %v2435_v49 }
 0x221   :  { %2438 = vmatpush3.bf16.msra.mxu1 %v2435_v49 }
 0x222   :  { %2440 = vmatprep.subr.bf16.mxu1 %v2439_v54 }
 0x225   :  { %2442 = vmatpush3.bf16.msra.mxu1 %v2439_v54 }
 0x226   :  { %2444 = vmatprep.subr.bf16.mxu1 %v2443_v32 }
 0x229   :  { %2446 = vmatpush3.bf16.msra.mxu1 %v2443_v32 }
 0x22a   :  { %2448 = vmatprep.subr.bf16.mxu1 %v2447_v16 }
 0x22d   :  { %2450 = vmatpush3.bf16.msra.mxu1 %v2447_v16 }
 0x22e   :  { %2452 = vmatprep.subr.bf16.mxu1 %v3223_v44 }
 0x231   :  { %2454 = vmatpush3.bf16.msra.mxu1 %v3223_v44 }
 0x232   :  { %2456 = vmatprep.subr.bf16.mxu1 %v3227_v34 }
 0x235   :  { %2458 = vmatpush3.bf16.msra.mxu1 %v3227_v34 }
 0x236   :  { %2460 = vmatprep.subr.bf16.mxu1 %v3020_v23 }
 0x238   :  { %2064 = vmatmul.mubr.f32.vlgmr.msra.gmra.mrb[0].mxu1 %v3237_v17 }
 0x239   :  { %2462 = vmatpush3.bf16.msra.mxu1 %v3020_v23  ;;  %2098 = vmatprep.mubr.f32.mxu1 %v894_v40 }
 0x23a   :  { %2464 = vmatprep.subr.bf16.mxu1 %v3024_v53 }
 0x23d   :  { %2466 = vmatpush3.bf16.msra.mxu1 %v3024_v53 }
 0x23e   :  { %2468 = vmatprep.subr.bf16.mxu1 %v3028_v58 }
 0x241   :  { %2470 = vmatpush3.bf16.msra.mxu1 %v3028_v58 }
 0x242   :  { %2472 = vmatprep.subr.bf16.mxu1 %v3032_v5 }
 0x245   :  { %2474 = vmatpush3.bf16.msra.mxu1 %v3032_v5 }
 0x246   :  { %2476 = vmatprep.subr.bf16.mxu1 %v3042_v14 }
 0x249   :  { %2478 = vmatpush3.bf16.msra.mxu1 %v3042_v14 }
 0x24a   :  { %2480 = vmatprep.subr.bf16.mxu1 %v3052_v45 }
 0x24d   :  { %2482 = vmatpush3.bf16.msra.mxu1 %v3052_v45 }
 0x24e   :  { %2484 = vmatprep.subr.bf16.mxu1 %v3066_v11 }
 0x251   :  { %2486 = vmatpush3.bf16.msra.mxu1 %v3066_v11 }
 0x252   :  { %2488 = vmatprep.subr.bf16.mxu1 %v3086_v47 }
 0x255   :  { %2490 = vmatpush3.bf16.msra.mxu1 %v3086_v47 }
 0x256   :  { %2492 = vmatprep.subr.bf16.mxu1 %v2491_v31 }
 0x258   :  { %2099 = vmatmul.mubr.f32.vlgmr.msra.gmra.mrb[0].mxu1 %v904_v39 }
 0x259   :  { %2494 = vmatpush3.bf16.msra.mxu1 %v2491_v31  ;;  %2133 = vmatprep.mubr.f32.mxu1 %v3234_v2 }
 0x25a   :  { %2496 = vmatprep.subr.bf16.mxu1 %v2495_v36 }
 0x25d   :  { %2498 = vmatpush3.bf16.msra.mxu1 %v2495_v36 }
 0x25e   :  { %2500 = vmatprep.subr.bf16.mxu1 %v2499_v20 }
 0x261   :  { %2502 = vmatpush3.bf16.msra.mxu1 %v2499_v20 }
 0x262   :  { %2504 = vmatprep.subr.bf16.mxu1 %v2503_v19 }
 0x265   :  { %2506 = vmatpush3.bf16.msra.mxu1 %v2503_v19 }
 0x266   :  { %2508 = vmatprep.subr.bf16.mxu1 %v2507_v43 }
 0x269   :  { %2510 = vmatpush3.bf16.msra.mxu1 %v2507_v43 }
 0x26a   :  { %2512 = vmatprep.subr.bf16.mxu1 %v2511_v60 }
 0x26d   :  { %2514 = vmatpush3.bf16.msra.mxu1 %v2511_v60 }
 0x26e   :  { %2516 = vmatprep.subr.bf16.mxu1 %v2515_v33 }
 0x271   :  { %2518 = vmatpush3.bf16.msra.mxu1 %v2515_v33 }
 0x272   :  { %2520 = vmatprep.subr.bf16.mxu1 %v2519_v10 }
 0x275   :  { %2522 = vmatpush3.bf16.msra.mxu1 %v2519_v10 }
 0x276   :  { %2524 = vmatprep.subr.bf16.mxu1 %v3020_v23 }
 0x278   :  { %2134 = vmatmul.mubr.f32.vlgmr.msra.gmra.mrb[0].mxu1 %v3232_v59 }
 0x279   :  { %2526 = vmatpush3.bf16.msra.mxu1 %v3020_v23  ;;  %2168 = vmatprep.mubr.f32.mxu1 %v3234_v2 }
 0x27a   :  { %2528 = vmatprep.subr.bf16.mxu1 %v3024_v53 }
 0x27d   :  { %2530 = vmatpush3.bf16.msra.mxu1 %v3024_v53 }
 0x27e   :  { %2532 = vmatprep.subr.bf16.mxu1 %v3028_v58 }
 0x281   :  { %2534 = vmatpush3.bf16.msra.mxu1 %v3028_v58 }
 0x282   :  { %2536 = vmatprep.subr.bf16.mxu1 %v3032_v5 }
 0x285   :  { %2538 = vmatpush3.bf16.msra.mxu1 %v3032_v5 }
 0x286   :  { %2540 = vmatprep.subr.bf16.mxu1 %v3042_v14 }
 0x289   :  { %2542 = vmatpush3.bf16.msra.mxu1 %v3042_v14 }
 0x28a   :  { %2544 = vmatprep.subr.bf16.mxu1 %v3052_v45 }
 0x28d   :  { %2546 = vmatpush3.bf16.msra.mxu1 %v3052_v45 }
 0x28e   :  { %2548 = vmatprep.subr.bf16.mxu1 %v3066_v11 }
 0x291   :  { %2550 = vmatpush3.bf16.msra.mxu1 %v3066_v11 }
 0x292   :  { %2552 = vmatprep.subr.bf16.mxu1 %v3086_v47 }
 0x295   :  { %2554 = vmatpush3.bf16.msra.mxu1 %v3086_v47 }
 0x298   :  { %2169 = vmatmul.mubr.f32.vlgmr.msra.gmra.mrb[0].mxu1 %v3232_v59 }
 0x299   :  { %2671 = shalt.err (!%p2668_p0)
}
 0x29a   :  { %s2672_s16 = scalar_lea.hbm %s3370_s5, 256 }
 0x29b   :  { %p2673_p1 = scmp.ne.s32.totalorder %s3370_s5, %s2672_s16  ;;  %p2676_p2 = scmp.lt.u32.totalorder %s2672_s16, %s3370_s5 }
 0x29d   :  { %p2678_p3 = pnand %p2676_p2, %p2673_p1 }
 0x29f   :  { %2681 = shalt.err (!%p2678_p3)
}
 0x2a0   :  { %1508 = dma.vmem_to_hbm [thread:$0]  %s1503_s12, 256, %s3370_s5, [#allocation4], %s2714_s9, %s2714_s9, %s2715_s10  }
 0x2a1   :  { %v1534_v23 = vld [vmem:[%s3369_s4] ss:$0 sm:$0xff]  ;;  %s2718_s25 = smov [#allocation9]  }
 0x2a2   :  { %s1514_s26 = sshll.u32 %s2718_s25, 4  ;;  %s1515_s26 = int_to_ptr.vmem [resolvable:$true] %s1514_s26 }
 0x2a3   :  { %s2682_s27 = scalar_lea.vmem %s1515_s26, 256  ;;  %p2687_p5 = scmp.lt.s32.totalorder %s1515_s26, %s1515_s26 }
 0x2a4   :  { %p2683_p4 = scmp.ne.s32.totalorder %s1515_s26, %s2682_s27  ;;  %p2688_p6 = scmp.lt.s32.totalorder %s2682_s27, %s2682_s27 }
 0x2a6   :  { %p2689_p7 = por %p2688_p6, %p2687_p5 }
 0x2a8   :  { %p2690_p8 = pnand %p2689_p7, %p2683_p4 }
 0x36b   :  { %v2170_v53 = vpop.f32.mrb[0].mxu1 }
 0x36c   :  { %v2557_v58 = vadd.f32 %v2170_v53, %v1534_v23  ;;  %v1485_v5 = vpop.f32.mrb[1].mxu1 }
 0x36d   :  { %v2558_v14 = vadd.f32 %v1534_v23, %v1485_v5 }
 0x36e   :  { %1496 = vst [vmem:[#allocation9 + $0x8] sm:$0xff] %v2557_v58 }
 0x36f   :  { %1495 = vst [vmem:[#allocation9] sm:$0xff] %v2558_v14 }
 0x370   :  { %2693 = shalt.err (!%p2690_p8)
}
 0x371   :  { %s2694_s4 = scalar_lea.hbm %s3371_s6, 256 }
 0x372   :  { %p2695_p9 = scmp.ne.s32.totalorder %s3371_s6, %s2694_s4  ;;  %p2698_p10 = scmp.lt.u32.totalorder %s2694_s4, %s3371_s6 }
 0x374   :  { %p2700_p11 = pnand %p2698_p10, %p2695_p9 }
 0x376   :  { %2703 = shalt.err (!%p2700_p11)
}
 0x377   :  { %1520 = dma.vmem_to_hbm [thread:$0]  %s1515_s26, 256, %s3371_s6, [#allocation10], %s2714_s9, %s2714_s9, %s2715_s10  }
 0x378   :  { %2708 = dma.done.wait [#allocation4], 256  }
 0x379   :  { %2709 = vsyncadd [#allocation4], 4294967040 }
 0x37a   :  { %2710 = dma.done.wait [#allocation10], 256  }
 0x37b   :  { %2711 = vsyncadd [#allocation10], 4294967040 }
 0x37c   :  { %1527 = vsyncpa [#allocation3], 1 }
 0x37d   :  { %1528 = vsyncpa [#allocation6], 1 }
 0x37e   :  { %1529 = vsyncpa [#allocation4], 1 }
 0x37f   :  { %1530 = vsyncpa [#allocation10], 1 }

</bundles_post_ra>
